<compile_context>
chip_gen: v7x
topology: tpu7x:2x2x1
jax: 0.10.0
libtpu: 0.0.40
codegen_flags: <defaults>
</compile_context>

<pallas_src>
import functools

import jax
import jax.numpy as jnp
from jax.experimental import pallas as pl
from jax.experimental.pallas import tpu as pltpu


def _spec_normalize_kernel(x_ref, o_ref, *, eps):
    # x_ref / o_ref view: (TR, HW).  Each row is one (b, c) slab flattened over
    # (H, W), so a per-row reduction == reduction over the last two dims.
    x = x_ref[...]
    min_ = jnp.min(x, axis=-1, keepdims=True)   # (TR, 1), exact in native dtype
    max_ = jnp.max(x, axis=-1, keepdims=True)   # (TR, 1)
    # One exact divide per row (TR total) instead of TR*HW divides.
    inv = 1.0 / ((max_ - min_).astype(jnp.float32) + eps)      # (TR, 1) f32
    y = (x.astype(jnp.float32) - min_.astype(jnp.float32)) * inv
    o_ref[...] = y.astype(o_ref.dtype)


def spec_normalize(x: jax.Array, eps: float = 1e-8,
                   target_block_bytes: int = 2 * 1024 * 1024) -> jax.Array:
    """Pallas equivalent of SpecNormalize.forward for NCHW inputs."""
    B, C, H, W = x.shape
    rows = B * C
    hw = H * W
    itemsize = jnp.dtype(x.dtype).itemsize

    # Sublane granularity depends on packing: 8 (f32), 16 (bf16), 32 (int8/fp8).
    sublane = max(8, 32 // max(1, itemsize))

    # Rows per grid step: multiple of the sublane granularity, sized so each
    # VMEM buffer is ~target_block_bytes.  Input + output double-buffered is
    # ~4x that, well under the 16 MiB scoped default on v5e (and far under the
    # v6e/v7x limits).
    tr = max(sublane,
             (target_block_bytes // max(1, hw * itemsize)) // sublane * sublane)
    rows_ceil = -(-rows // sublane) * sublane
    tr = min(tr, rows_ceil)

    # No explicit padding: the grid over-covers the row axis and Pallas masks
    # the edge block (per-row math keeps any garbage rows isolated, and their
    # writes are dropped).
    grid = (pl.cdiv(rows, tr),)

    x2 = x.reshape(rows, hw)   # free view for contiguous NCHW

    kernel = functools.partial(_spec_normalize_kernel, eps=eps)
    out2 = pl.pallas_call(
        kernel,
        out_shape=jax.ShapeDtypeStruct((rows, hw), x.dtype),
        grid_spec=pltpu.PrefetchScalarGridSpec(
            num_scalar_prefetch=0,
            grid=grid,
            in_specs=[pl.BlockSpec((tr, hw), lambda i: (i, 0))],
            out_specs=pl.BlockSpec((tr, hw), lambda i: (i, 0)),
        ),
        compiler_params=pltpu.CompilerParams(
            dimension_semantics=("parallel",),
        ),
        cost_estimate=pl.CostEstimate(
            flops=4 * rows * hw + 2 * rows,
            transcendentals=0,
            bytes_accessed=2 * rows * hw * itemsize,
        ),
    )(x2)

    return out2.reshape(B, C, H, W)


def spec_normalize_ref(x: jax.Array, eps: float = 1e-8) -> jax.Array:
    """Pure-JAX reference mirroring the PyTorch forward."""
    min_ = jnp.min(jnp.min(x, axis=-1, keepdims=True), axis=-2, keepdims=True)
    max_ = jnp.max(jnp.max(x, axis=-1, keepdims=True), axis=-2, keepdims=True)
    return (x - min_) / (max_ - min_ + eps)


if __name__ == "__main__":
    key = jax.random.PRNGKey(0)
    B, C, H, W = 2, 4, 16, 16
    x = jax.random.normal(key, (B, C, H, W), dtype=jnp.float32)

    out = spec_normalize(x)
    out = jax.block_until_ready(out)

    ref = spec_normalize_ref(x)
    assert out.shape == x.shape and out.dtype == x.dtype
    assert jnp.allclose(out, ref, atol=1e-6, rtol=1e-6), "mismatch vs reference"

    print("KERNEL_OK")
</pallas_src>

<mosaic_0001>
module attributes {stable_mosaic.version = 11 : i64} {
  func.func @_spec_normalize_kernel(%arg0: i32, %arg1: memref<8x256xf32, #tpu.memory_space<vmem>>, %arg2: memref<8x256xf32, #tpu.memory_space<vmem>>) attributes {dimension_semantics = [#tpu.dimension_semantics<parallel>], iteration_bounds = array<i64: 1>, scalar_prefetch = 0 : i64, scratch_operands = 0 : i64, tpu.core_type = #tpu.core_type<tc>, window_params = [{transform_indices = @transform_0, window_bounds = array<i64: 8, 256>}, {transform_indices = @transform_1, window_bounds = array<i64: 8, 256>}]} {
    %c0 = arith.constant 0 : index
    %c0_0 = arith.constant 0 : index
    %0 = vector.load %arg1[%c0, %c0_0] : memref<8x256xf32, #tpu.memory_space<vmem>>, vector<8x256xf32>
    %cst = arith.constant dense<0x7F800000> : vector<8xf32>
    %1 = vector.multi_reduction <minimumf>, %0, %cst [1] : vector<8x256xf32> to vector<8xf32>
    %2 = vector.shape_cast %1 : vector<8xf32> to vector<8x1xf32>
    %cst_1 = arith.constant dense<0xFF800000> : vector<8xf32>
    %3 = vector.multi_reduction <maximumf>, %0, %cst_1 [1] : vector<8x256xf32> to vector<8xf32>
    %4 = vector.shape_cast %3 : vector<8xf32> to vector<8x1xf32>
    %5 = arith.subf %4, %2 : vector<8x1xf32>
    %cst_2 = arith.constant 9.99999993E-9 : f32
    %6 = vector.broadcast %cst_2 : f32 to vector<8x1xf32>
    %7 = arith.addf %5, %6 : vector<8x1xf32>
    %cst_3 = arith.constant 1.000000e+00 : f32
    %8 = vector.broadcast %cst_3 : f32 to vector<8x1xf32>
    %9 = arith.divf %8, %7 : vector<8x1xf32>
    %10 = vector.broadcast %2 : vector<8x1xf32> to vector<8x256xf32>
    %11 = arith.subf %0, %10 : vector<8x256xf32>
    %12 = vector.broadcast %9 : vector<8x1xf32> to vector<8x256xf32>
    %13 = arith.mulf %11, %12 : vector<8x256xf32>
    %c0_4 = arith.constant 0 : index
    %c0_5 = arith.constant 0 : index
    %14 = vector.load %arg2[%c0_4, %c0_5] : memref<8x256xf32, #tpu.memory_space<vmem>>, vector<8x256xf32>
    tpu.vector_store %arg2[%c0_4, %c0_5], %13 {strides = array<i32>} : memref<8x256xf32, #tpu.memory_space<vmem>>, vector<8x256xf32>,
    return
  }
  func.func @transform_0(%arg0: i32) -> (i32, i32) {
    %c0_i32 = arith.constant 0 : i32
    %c0_i32_0 = arith.constant 0 : i32
    return %arg0, %c0_i32 : i32, i32
  }
  func.func @transform_1(%arg0: i32) -> (i32, i32) {
    %c0_i32 = arith.constant 0 : i32
    %c0_i32_0 = arith.constant 0 : i32
    return %arg0, %c0_i32 : i32, i32
  }
}

</mosaic_0001>

<bundles_post_ra>
// kernel: tpu_custom_call.1
= control target key start
LH: loop header
LB: loop body
LE: loop exit
PB: predicated region body
PF: predicated region fallthrough
CT: control target
= control target key end

     0   :  { %6 = vsyncpa [#allocation3], 0  ;;  %s142_s0 = inlined_call_operand.hbm [shape: f32[8,256], index: 0, kind: input, shape index: {}]   ;;  %s143_s1 = inlined_call_operand.hbm [shape: f32[8,256], index: 1, kind: output, shape index: {}]  }
   0x1   :  { %7 = vsyncpa [#allocation4], 0  ;;  %s106_s6 = smov [#allocation2]   ;;  %s58_s10 = scalar_lea.hbm %s142_s0, 256 }
   0x2   :  { %s14_s7 = sshll.u32 %s106_s6, 4  ;;  %p59_p0 = scmp.ne.s32.totalorder %s142_s0, %s58_s10  ;;  %s15_s7 = int_to_ptr.vmem [resolvable:$true] %s14_s7 }
   0x3   :  { %p62_p1 = scmp.lt.u32.totalorder %s58_s10, %s142_s0 }
   0x5   :  { %p64_p2 = pnand %p62_p1, %p59_p0 }
   0x7   :  { %67 = shalt.err (!%p64_p2)
}
   0x8   :  { %s68_s15 = scalar_lea.vmem %s15_s7, 256  ;;  %p73_p4 = scmp.lt.s32.totalorder %s15_s7, %s15_s7 }
   0x9   :  { %p69_p3 = scmp.ne.s32.totalorder %s15_s7, %s68_s15  ;;  %p74_p5 = scmp.lt.s32.totalorder %s68_s15, %s68_s15 }
   0xb   :  { %p75_p6 = por %p74_p5, %p73_p4 }
   0xd   :  { %p76_p7 = pnand %p75_p6, %p69_p3 }
   0xf   :  { %79 = shalt.err (!%p76_p7)
}
  0x10   :  { %17 = dma.hbm_to_vmem [thread:$0]  %s142_s0, 256, %s15_s7, [#allocation3]  }
  0x11   :  { %102 = dma.done.wait [#allocation3], 256  }
  0x12   :  { %103 = vsyncadd [#allocation3], 4294967040  ;;  %v21_v0 = vld [vmem:[#allocation2] sm:$0xff]  ;;  %v22_v1 = vld [vmem:[#allocation2 + $0x8] sm:$0xff]  ;;  %s107_s18 = smov [#allocation5]  }
  0x13   :  { %v23_v2 = vmin.f32 %v21_v0, %v22_v1  ;;  %v26_v3 = vmax.f32 %v21_v0, %v22_v1  ;;  %s45_s19 = sshll.u32 %s107_s18, 4  ;;  %s46_s19 = int_to_ptr.vmem [resolvable:$true] %s45_s19 }
  0x14   :  { %s80_s0 = scalar_lea.vmem %s46_s19, 256  ;;  %p85_p9 = scmp.lt.s32.totalorder %s46_s19, %s46_s19 }
  0x15   :  { %24 = vmin.xlane.f32.xlu0 %v23_v2  ;;  %p81_p8 = scmp.ne.s32.totalorder %s46_s19, %s80_s0  ;;  %p86_p10 = scmp.lt.s32.totalorder %s80_s0, %s80_s0 }
  0x17   :  { %p87_p11 = por %p86_p10, %p85_p9 }
  0x19   :  { %27 = vmax.xlane.f32.xlu0 %v26_v3  ;;  %p88_p12 = pnand %p87_p11, %p81_p8 }
  0xa2   :  { %v25_v4 = vpop.xlane.xlu0 %24 }
  0xa3   :  { %v33_v8 = vsub.f32 %v21_v0, %v25_v4  ;;  %v34_v9 = vsub.f32 %v22_v1, %v25_v4 }
  0xa6   :  { %v28_v5 = vpop.xlane.xlu0 %27 }
  0xa7   :  { %v29_v6 = vsub.f32 %v28_v5, %v25_v4 }
  0xa9   :  { %v30_v7 = vadd.f32 1e-08, %v29_v6 }
  0xab   :  { %56 = vrcp.f32 %v30_v7 }
  0xb5   :  { %v57_v10 = vpop.eup %56 }
  0xb6   :  { %v35_v11 = vmul.f32 %v57_v10, %v33_v8  ;;  %v36_v12 = vmul.f32 %v57_v10, %v34_v9 }
  0xb8   :  { %37 = vst [vmem:[#allocation5] sm:$0xff] %v35_v11  ;;  %38 = vst [vmem:[#allocation5 + $0x8] sm:$0xff] %v36_v12 }
  0xb9   :  { %91 = shalt.err (!%p88_p12)
}
  0xba   :  { %s92_s22 = scalar_lea.hbm %s143_s1, 256 }
  0xbb   :  { %p93_p13 = scmp.ne.s32.totalorder %s143_s1, %s92_s22  ;;  %p96_p0 = scmp.lt.u32.totalorder %s92_s22, %s143_s1 }
  0xbd   :  { %p98_p1 = pnand %p96_p0, %p93_p13 }
  0xbf   :  { %101 = shalt.err (!%p98_p1)
}
  0xc0   :  { %48 = dma.vmem_to_hbm [thread:$0]  %s46_s19, 256, %s143_s1, [#allocation4]  }
  0xc1   :  { %104 = dma.done.wait [#allocation4], 256  }
  0xc2   :  { %105 = vsyncadd [#allocation4], 4294967040 }
  0xc3   :  { %52 = vsyncpa [#allocation3], 1 }
  0xc4   :  { %53 = vsyncpa [#allocation4], 1 }

</bundles_post_ra>
